<compile_context>
chip_gen: v7x
topology: tpu7x:2x2x1
jax: 0.10.0
libtpu: 0.0.40
codegen_flags: <defaults>
</compile_context>

<pallas_src>
import functools

import jax
import jax.numpy as jnp
from jax import lax
from jax.experimental import pallas as pl
from jax.experimental.pallas import tpu as pltpu


def convdown_kernel(xpT_ref, w1_ref, b1_ref, wc_ref, b2_ref, hw_ref, o_ref, stk_ref,
                    *, Ho, Wo, M0):
    # xpT_ref : (1, 4*Cin, M) bf16  transposed im2col of the 2x2/stride-2 patches (one image)
    # w1_ref  : (Cin, 4*Cin)  bf16  conv1 weight, columns flattened as ci*4 + dh*2 + dw
    # b1_ref  : (Cin, 1)      f32
    # wc_ref  : (Cout, 9*Cin) bf16  depthwise(3x3) folded into pointwise(1x1), tap-major cols
    # b2_ref  : (Cout, 1)     f32
    # hw_ref  : (2, M)        i32   row / col index of each flattened output pixel
    # o_ref   : (1, Cout, M)  f32   channels on sublanes / pixels on lanes (NCHW order)
    # stk_ref : (9*Cin, M)    f32   VMEM scratch holding the 9 stacked tap slabs
    M = xpT_ref.shape[2]
    Cin = w1_ref.shape[0]

    # conv1 (2x2 / stride 2) as one MXU matmul (bf16 x bf16 -> f32 acc) + bias + LeakyReLU.
    y = jnp.dot(w1_ref[...], xpT_ref[0], preferred_element_type=jnp.float32)
    y = y + b1_ref[...]
    y = jnp.maximum(y, 0.01 * y)                       # LeakyReLU(0.01)

    # Zero the lane-padding pixels of y explicitly so nothing non-zero can leak through the
    # circular rolls below (valid lanes are additionally protected by the per-tap masks;
    # this makes the invariant explicit instead of implicit).
    lane = lax.broadcasted_iota(jnp.int32, (1, M), 1)
    y = jnp.where(lane < M0, y, 0.0)

    h = hw_ref[0:1, :]                                 # (1, M) output-row index per pixel
    w = hw_ref[1:2, :]                                 # (1, M) output-col index per pixel

    # Depthwise 3x3 (pad 1) folded into the 1x1 conv: for each of the 9 taps, shift y along
    # the flattened-pixel lane axis in-register (XLU roll), zero out-of-image pixels with a
    # VPU-computed mask, and stack the slab into the (9*Cin, M) scratch.  One K=9*Cin MXU
    # contraction then produces all taps at once.
    t = 0
    for ddh in (-1, 0, 1):
        for ddw in (-1, 0, 1):
            s = ddh * Wo + ddw                         # flat-pixel offset of this tap
            if s == 0:                                 # center tap: no shift / no mask
                slab = y
            else:
                # pltpu.roll matches jnp.roll: out[p] = in[(p - shift) % M].
                # We want slab[p] = y[p + s]  =>  shift = (-s) % M.
                slab = pltpu.roll(y, shift=(-s) % M, axis=1)
                ok = ((h + ddh >= 0) & (h + ddh < Ho) &
                      (w + ddw >= 0) & (w + ddw < Wo))
                slab = jnp.where(ok, slab, 0.0)
            stk_ref[pl.ds(t * Cin, Cin), :] = slab     # static, sublane-aligned store
            t += 1

    acc = jnp.dot(wc_ref[...], stk_ref[...].astype(jnp.bfloat16),
                  preferred_element_type=jnp.float32)
    o_ref[0] = (acc + b2_ref[...]).astype(o_ref.dtype)


@jax.jit
def conv_down(x_nchw, w1, b1, wdw, w2, b2):
    """ConvDown(dsconv=True) forward. x_nchw: (B, Cin, H, W) f32 -> (B, Cout, H//2, W//2)."""
    B, Cin, H, W = x_nchw.shape
    Ho, Wo = H // 2, W // 2
    M0 = Ho * Wo
    M = ((M0 + 127) // 128) * 128                      # pad flat pixels to full 128-lane vregs
    Cout = w2.shape[0]

    # Transposed im2col of the 2x2/stride-2 patches (bf16 operand for the MXU):
    #   xpT[b, ci*4 + dh*2 + dw, ho*Wo + wo] = x[b, ci, 2*ho + dh, 2*wo + dw]
    xpT = (x_nchw.reshape(B, Cin, Ho, 2, Wo, 2)
                 .transpose(0, 1, 3, 5, 2, 4)
                 .reshape(B, 4 * Cin, M0))
    xpT = jnp.pad(xpT, ((0, 0), (0, 0), (0, M - M0))).astype(jnp.bfloat16)

    # conv1 weight (Cin, Cin, 2, 2) -> (Cin, 4*Cin), column index = ci*4 + dh*2 + dw.
    w1m = w1.reshape(Cin, 4 * Cin).astype(jnp.bfloat16)
    b1m = b1.reshape(Cin, 1)

    # Fold depthwise(3x3, no bias) into pointwise(1x1), tap-major / channel-minor columns:
    #   wc[co, t*Cin + ci] = w2[co, ci] * wdw[ci, 0, dh, dw],  t = dh*3 + dw
    w2_2d = w2[:, :, 0, 0]                                             # (Cout, Cin)
    wdw_t = jnp.transpose(wdw[:, 0, :, :], (1, 2, 0)).reshape(9, Cin)  # (9, Cin)
    wcm = (w2_2d[None, :, :] * wdw_t[:, None, :]).transpose(1, 0, 2)   # (Cout, 9, Cin)
    wcm = wcm.reshape(Cout, 9 * Cin).astype(jnp.bfloat16)
    b2m = b2.reshape(Cout, 1)

    # Tiny (2, M) int32 row/col index of each flattened output pixel; lane padding gets an
    # out-of-range sentinel so every shifted tap masks it out.  (9x smaller than the old
    # per-tap f32 mask tensor; the masks themselves are built in-kernel.)
    h_idx = jnp.repeat(jnp.arange(Ho, dtype=jnp.int32), Wo)
    w_idx = jnp.tile(jnp.arange(Wo, dtype=jnp.int32), Ho)
    hw = jnp.stack([h_idx, w_idx], axis=0)
    hw = jnp.pad(hw, ((0, 0), (0, M - M0)), constant_values=max(Ho, Wo) + 1)

    kernel = functools.partial(convdown_kernel, Ho=Ho, Wo=Wo, M0=M0)

    out_flat = pl.pallas_call(
        kernel,
        out_shape=jax.ShapeDtypeStruct((B, Cout, M), jnp.float32),
        grid_spec=pltpu.PrefetchScalarGridSpec(
            num_scalar_prefetch=0,
            grid=(B,),
            in_specs=[
                pl.BlockSpec((1, 4 * Cin, M), lambda b: (b, 0, 0)),
                pl.BlockSpec((Cin, 4 * Cin), lambda b: (0, 0)),
                pl.BlockSpec((Cin, 1), lambda b: (0, 0)),
                pl.BlockSpec((Cout, 9 * Cin), lambda b: (0, 0)),
                pl.BlockSpec((Cout, 1), lambda b: (0, 0)),
                pl.BlockSpec((2, M), lambda b: (0, 0)),
            ],
            out_specs=pl.BlockSpec((1, Cout, M), lambda b: (b, 0, 0)),
            scratch_shapes=[pltpu.VMEM((9 * Cin, M), jnp.float32)],
        ),
        compiler_params=pltpu.CompilerParams(
            # No vmem_limit_bytes override: blocks here are small.  For production sizes,
            # size it per generation (~75% of pltpu.get_tpu_info().vmem_capacity_bytes);
            # never hard-code 64 MiB (that is all of a v7x core's VMEM).
            dimension_semantics=("parallel",),
        ),
    )(xpT, w1m, b1m, wcm, b2m, hw)

    # Output is already channels-major (NCHW): drop lane padding and reshape (no transpose).
    return out_flat[:, :, :M0].reshape(B, Cout, Ho, Wo)


def conv_down_ref(x, w1, b1, wdw, w2, b2):
    """Pure-JAX f32 reference (NCHW), mirrors the PyTorch nn.Sequential exactly."""
    dn = ('NCHW', 'OIHW', 'NCHW')
    Cin = x.shape[1]
    y = lax.conv_general_dilated(x, w1, (2, 2), 'VALID', dimension_numbers=dn,
                                 precision=lax.Precision.HIGHEST) + b1.reshape(1, -1, 1, 1)
    y = jnp.where(y > 0, y, 0.01 * y)
    y = lax.conv_general_dilated(y, wdw, (1, 1), ((1, 1), (1, 1)), dimension_numbers=dn,
                                 feature_group_count=Cin, precision=lax.Precision.HIGHEST)
    y = lax.conv_general_dilated(y, w2, (1, 1), 'VALID', dimension_numbers=dn,
                                 precision=lax.Precision.HIGHEST) + b2.reshape(1, -1, 1, 1)
    return y


if __name__ == "__main__":
    # Small shapes consistent with CANNet's down1 = ConvDown(channels, int(channels*1.25)):
    # channels=8 -> bottleneck=10.
    B, Cin, Cout, H, W = 2, 8, 10, 16, 16
    key = jax.random.PRNGKey(0)
    kx, k1, kb1, kdw, k2, kb2 = jax.random.split(key, 6)

    x = jax.random.normal(kx, (B, Cin, H, W), jnp.float32)
    # Deterministic synthetic parameters (PyTorch Conv2d weight/bias shapes)
    w1 = 0.25 * jax.random.normal(k1, (Cin, Cin, 2, 2), jnp.float32)    # conv 2x2 s2
    b1 = 0.10 * jax.random.normal(kb1, (Cin,), jnp.float32)
    wdw = 0.25 * jax.random.normal(kdw, (Cin, 1, 3, 3), jnp.float32)    # depthwise 3x3
    w2 = 0.25 * jax.random.normal(k2, (Cout, Cin, 1, 1), jnp.float32)   # pointwise 1x1
    b2 = 0.10 * jax.random.normal(kb2, (Cout,), jnp.float32)

    out = jax.block_until_ready(conv_down(x, w1, b1, wdw, w2, b2))
    ref = conv_down_ref(x, w1, b1, wdw, w2, b2)

    assert out.shape == (B, Cout, H // 2, W // 2), out.shape
    # Accuracy contract: bf16 matmul operands with f32 accumulation vs. an f32
    # Precision.HIGHEST reference -> a few 1e-3 absolute / <1e-2 relative error.
    err = float(jnp.max(jnp.abs(out - ref)))
    rel = float(jnp.linalg.norm(out - ref) / jnp.linalg.norm(ref))
    assert err < 2e-2 and rel < 1e-2, (err, rel)
    print("KERNEL_OK")
</pallas_src>

<mosaic_0001>
module attributes {stable_mosaic.version = 11 : i64} {
  func.func @convdown_kernel(%arg0: i32, %arg1: memref<1x32x128xbf16, #tpu.memory_space<vmem>>, %arg2: memref<8x32xbf16, #tpu.memory_space<vmem>>, %arg3: memref<8x1xf32, #tpu.memory_space<vmem>>, %arg4: memref<10x72xbf16, #tpu.memory_space<vmem>>, %arg5: memref<10x1xf32, #tpu.memory_space<vmem>>, %arg6: memref<2x128xi32, #tpu.memory_space<vmem>>, %arg7: memref<1x10x128xf32, #tpu.memory_space<vmem>>, %arg8: memref<72x128xf32, #tpu.memory_space<vmem>>) attributes {dimension_semantics = [#tpu.dimension_semantics<parallel>], iteration_bounds = array<i64: 2>, scalar_prefetch = 0 : i64, scratch_operands = 1 : i64, tpu.core_type = #tpu.core_type<tc>, window_params = [{transform_indices = @transform_0, window_bounds = array<i64: 1, 32, 128>}, {pipeline_mode = #tpu.pipeline_mode<synchronous>, transform_indices = @transform_1, window_bounds = array<i64: 8, 32>}, {pipeline_mode = #tpu.pipeline_mode<synchronous>, transform_indices = @transform_2, window_bounds = array<i64: 8, 1>}, {pipeline_mode = #tpu.pipeline_mode<synchronous>, transform_indices = @transform_3, window_bounds = array<i64: 10, 72>}, {pipeline_mode = #tpu.pipeline_mode<synchronous>, transform_indices = @transform_4, window_bounds = array<i64: 10, 1>}, {pipeline_mode = #tpu.pipeline_mode<synchronous>, transform_indices = @transform_5, window_bounds = array<i64: 2, 128>}, {transform_indices = @transform_6, window_bounds = array<i64: 1, 10, 128>}]} {
    %c0 = arith.constant 0 : index
    %c0_0 = arith.constant 0 : index
    %0 = vector.load %arg2[%c0, %c0_0] : memref<8x32xbf16, #tpu.memory_space<vmem>>, vector<8x32xbf16>
    %c0_1 = arith.constant 0 : index
    %c0_2 = arith.constant 0 : index
    %c0_3 = arith.constant 0 : index
    %1 = vector.load %arg1[%c0_1, %c0_2, %c0_3] : memref<1x32x128xbf16, #tpu.memory_space<vmem>>, vector<1x32x128xbf16>
    %2 = vector.shape_cast %1 : vector<1x32x128xbf16> to vector<32x128xbf16>
    %cst = arith.constant dense<0.000000e+00> : vector<8x128xf32>
    %3 = tpu.matmul %0, %2, %cst {dimension_numbers = #tpu.dot_dimension_numbers<[1], [0], [0], [1], [0, 0, 1, 1], [], []>} : vector<8x32xbf16>, vector<32x128xbf16>, vector<8x128xf32> -> vector<8x128xf32>
    %c0_4 = arith.constant 0 : index
    %c0_5 = arith.constant 0 : index
    %4 = vector.load %arg3[%c0_4, %c0_5] : memref<8x1xf32, #tpu.memory_space<vmem>>, vector<8x1xf32>
    %5 = vector.broadcast %4 : vector<8x1xf32> to vector<8x128xf32>
    %6 = arith.addf %3, %5 : vector<8x128xf32>
    %cst_6 = arith.constant 0.00999999977 : f32
    %7 = vector.broadcast %cst_6 : f32 to vector<8x128xf32>
    %8 = arith.mulf %7, %6 : vector<8x128xf32>
    %9 = arith.maximumf %6, %8 : vector<8x128xf32>
    %10 = tpu.iota {dimensions = array<i32: 1>} : vector<1x128xi32>
    %c64_i32 = arith.constant 64 : i32
    %11 = vector.broadcast %c64_i32 : i32 to vector<1x128xi32>
    %12 = arith.cmpi slt, %10, %11 : vector<1x128xi32>
    %cst_7 = arith.constant 0.000000e+00 : f32
    %13 = vector.shape_cast %12 : vector<1x128xi1> to vector<1x128xi1>
    %14 = vector.broadcast %13 : vector<1x128xi1> to vector<8x128xi1>
    %15 = vector.broadcast %cst_7 : f32 to vector<8x128xf32>
    %16 = arith.select %14, %9, %15 : vector<8x128xi1>, vector<8x128xf32>
    %c0_8 = arith.constant 0 : index
    %c0_9 = arith.constant 0 : index
    %17 = vector.load %arg6[%c0_8, %c0_9] : memref<2x128xi32, #tpu.memory_space<vmem>>, vector<1x128xi32>
    %c1 = arith.constant 1 : index
    %c0_10 = arith.constant 0 : index
    %18 = vector.load %arg6[%c1, %c0_10] : memref<2x128xi32, #tpu.memory_space<vmem>>, vector<1x128xi32>
    %c9_i32 = arith.constant 9 : i32
    %19 = tpu.dynamic_rotate %16 by %c9_i32 dim 1 : vector<8x128xf32>, i32 -> vector<8x128xf32>
    %c-1_i32 = arith.constant -1 : i32
    %20 = vector.broadcast %c-1_i32 : i32 to vector<1x128xi32>
    %21 = arith.addi %17, %20 : vector<1x128xi32>
    %c0_i32 = arith.constant 0 : i32
    %22 = vector.broadcast %c0_i32 : i32 to vector<1x128xi32>
    %23 = arith.cmpi sge, %21, %22 : vector<1x128xi32>
    %c-1_i32_11 = arith.constant -1 : i32
    %24 = vector.broadcast %c-1_i32_11 : i32 to vector<1x128xi32>
    %25 = arith.addi %17, %24 : vector<1x128xi32>
    %c8_i32 = arith.constant 8 : i32
    %26 = vector.broadcast %c8_i32 : i32 to vector<1x128xi32>
    %27 = arith.cmpi slt, %25, %26 : vector<1x128xi32>
    %28 = arith.andi %23, %27 : vector<1x128xi1>
    %c-1_i32_12 = arith.constant -1 : i32
    %29 = vector.broadcast %c-1_i32_12 : i32 to vector<1x128xi32>
    %30 = arith.addi %18, %29 : vector<1x128xi32>
    %c0_i32_13 = arith.constant 0 : i32
    %31 = vector.broadcast %c0_i32_13 : i32 to vector<1x128xi32>
    %32 = arith.cmpi sge, %30, %31 : vector<1x128xi32>
    %33 = arith.andi %28, %32 : vector<1x128xi1>
    %c-1_i32_14 = arith.constant -1 : i32
    %34 = vector.broadcast %c-1_i32_14 : i32 to vector<1x128xi32>
    %35 = arith.addi %18, %34 : vector<1x128xi32>
    %c8_i32_15 = arith.constant 8 : i32
    %36 = vector.broadcast %c8_i32_15 : i32 to vector<1x128xi32>
    %37 = arith.cmpi slt, %35, %36 : vector<1x128xi32>
    %38 = arith.andi %33, %37 : vector<1x128xi1>
    %cst_16 = arith.constant 0.000000e+00 : f32
    %39 = vector.shape_cast %38 : vector<1x128xi1> to vector<1x128xi1>
    %40 = vector.broadcast %39 : vector<1x128xi1> to vector<8x128xi1>
    %41 = vector.broadcast %cst_16 : f32 to vector<8x128xf32>
    %42 = arith.select %40, %19, %41 : vector<8x128xi1>, vector<8x128xf32>
    %c0_17 = arith.constant 0 : index
    %c0_18 = arith.constant 0 : index
    %43 = vector.load %arg8[%c0_17, %c0_18] : memref<72x128xf32, #tpu.memory_space<vmem>>, vector<8x128xf32>
    tpu.vector_store %arg8[%c0_17, %c0_18], %42 {strides = array<i32>} : memref<72x128xf32, #tpu.memory_space<vmem>>, vector<8x128xf32>,
    %c8_i32_19 = arith.constant 8 : i32
    %44 = tpu.dynamic_rotate %16 by %c8_i32_19 dim 1 : vector<8x128xf32>, i32 -> vector<8x128xf32>
    %c-1_i32_20 = arith.constant -1 : i32
    %45 = vector.broadcast %c-1_i32_20 : i32 to vector<1x128xi32>
    %46 = arith.addi %17, %45 : vector<1x128xi32>
    %c0_i32_21 = arith.constant 0 : i32
    %47 = vector.broadcast %c0_i32_21 : i32 to vector<1x128xi32>
    %48 = arith.cmpi sge, %46, %47 : vector<1x128xi32>
    %c-1_i32_22 = arith.constant -1 : i32
    %49 = vector.broadcast %c-1_i32_22 : i32 to vector<1x128xi32>
    %50 = arith.addi %17, %49 : vector<1x128xi32>
    %c8_i32_23 = arith.constant 8 : i32
    %51 = vector.broadcast %c8_i32_23 : i32 to vector<1x128xi32>
    %52 = arith.cmpi slt, %50, %51 : vector<1x128xi32>
    %53 = arith.andi %48, %52 : vector<1x128xi1>
    %c0_i32_24 = arith.constant 0 : i32
    %54 = vector.broadcast %c0_i32_24 : i32 to vector<1x128xi32>
    %55 = arith.addi %18, %54 : vector<1x128xi32>
    %c0_i32_25 = arith.constant 0 : i32
    %56 = vector.broadcast %c0_i32_25 : i32 to vector<1x128xi32>
    %57 = arith.cmpi sge, %55, %56 : vector<1x128xi32>
    %58 = arith.andi %53, %57 : vector<1x128xi1>
    %c0_i32_26 = arith.constant 0 : i32
    %59 = vector.broadcast %c0_i32_26 : i32 to vector<1x128xi32>
    %60 = arith.addi %18, %59 : vector<1x128xi32>
    %c8_i32_27 = arith.constant 8 : i32
    %61 = vector.broadcast %c8_i32_27 : i32 to vector<1x128xi32>
    %62 = arith.cmpi slt, %60, %61 : vector<1x128xi32>
    %63 = arith.andi %58, %62 : vector<1x128xi1>
    %cst_28 = arith.constant 0.000000e+00 : f32
    %64 = vector.shape_cast %63 : vector<1x128xi1> to vector<1x128xi1>
    %65 = vector.broadcast %64 : vector<1x128xi1> to vector<8x128xi1>
    %66 = vector.broadcast %cst_28 : f32 to vector<8x128xf32>
    %67 = arith.select %65, %44, %66 : vector<8x128xi1>, vector<8x128xf32>
    %c8 = arith.constant 8 : index
    %c0_29 = arith.constant 0 : index
    %68 = vector.load %arg8[%c8, %c0_29] : memref<72x128xf32, #tpu.memory_space<vmem>>, vector<8x128xf32>
    tpu.vector_store %arg8[%c8, %c0_29], %67 {strides = array<i32>} : memref<72x128xf32, #tpu.memory_space<vmem>>, vector<8x128xf32>,
    %c7_i32 = arith.constant 7 : i32
    %69 = tpu.dynamic_rotate %16 by %c7_i32 dim 1 : vector<8x128xf32>, i32 -> vector<8x128xf32>
    %c-1_i32_30 = arith.constant -1 : i32
    %70 = vector.broadcast %c-1_i32_30 : i32 to vector<1x128xi32>
    %71 = arith.addi %17, %70 : vector<1x128xi32>
    %c0_i32_31 = arith.constant 0 : i32
    %72 = vector.broadcast %c0_i32_31 : i32 to vector<1x128xi32>
    %73 = arith.cmpi sge, %71, %72 : vector<1x128xi32>
    %c-1_i32_32 = arith.constant -1 : i32
    %74 = vector.broadcast %c-1_i32_32 : i32 to vector<1x128xi32>
    %75 = arith.addi %17, %74 : vector<1x128xi32>
    %c8_i32_33 = arith.constant 8 : i32
    %76 = vector.broadcast %c8_i32_33 : i32 to vector<1x128xi32>
    %77 = arith.cmpi slt, %75, %76 : vector<1x128xi32>
    %78 = arith.andi %73, %77 : vector<1x128xi1>
    %c1_i32 = arith.constant 1 : i32
    %79 = vector.broadcast %c1_i32 : i32 to vector<1x128xi32>
    %80 = arith.addi %18, %79 : vector<1x128xi32>
    %c0_i32_34 = arith.constant 0 : i32
    %81 = vector.broadcast %c0_i32_34 : i32 to vector<1x128xi32>
    %82 = arith.cmpi sge, %80, %81 : vector<1x128xi32>
    %83 = arith.andi %78, %82 : vector<1x128xi1>
    %c1_i32_35 = arith.constant 1 : i32
    %84 = vector.broadcast %c1_i32_35 : i32 to vector<1x128xi32>
    %85 = arith.addi %18, %84 : vector<1x128xi32>
    %c8_i32_36 = arith.constant 8 : i32
    %86 = vector.broadcast %c8_i32_36 : i32 to vector<1x128xi32>
    %87 = arith.cmpi slt, %85, %86 : vector<1x128xi32>
    %88 = arith.andi %83, %87 : vector<1x128xi1>
    %cst_37 = arith.constant 0.000000e+00 : f32
    %89 = vector.shape_cast %88 : vector<1x128xi1> to vector<1x128xi1>
    %90 = vector.broadcast %89 : vector<1x128xi1> to vector<8x128xi1>
    %91 = vector.broadcast %cst_37 : f32 to vector<8x128xf32>
    %92 = arith.select %90, %69, %91 : vector<8x128xi1>, vector<8x128xf32>
    %c16 = arith.constant 16 : index
    %c0_38 = arith.constant 0 : index
    %93 = vector.load %arg8[%c16, %c0_38] : memref<72x128xf32, #tpu.memory_space<vmem>>, vector<8x128xf32>
    tpu.vector_store %arg8[%c16, %c0_38], %92 {strides = array<i32>} : memref<72x128xf32, #tpu.memory_space<vmem>>, vector<8x128xf32>,
    %c1_i32_39 = arith.constant 1 : i32
    %94 = tpu.dynamic_rotate %16 by %c1_i32_39 dim 1 : vector<8x128xf32>, i32 -> vector<8x128xf32>
    %c0_i32_40 = arith.constant 0 : i32
    %95 = vector.broadcast %c0_i32_40 : i32 to vector<1x128xi32>
    %96 = arith.addi %17, %95 : vector<1x128xi32>
    %c0_i32_41 = arith.constant 0 : i32
    %97 = vector.broadcast %c0_i32_41 : i32 to vector<1x128xi32>
    %98 = arith.cmpi sge, %96, %97 : vector<1x128xi32>
    %c0_i32_42 = arith.constant 0 : i32
    %99 = vector.broadcast %c0_i32_42 : i32 to vector<1x128xi32>
    %100 = arith.addi %17, %99 : vector<1x128xi32>
    %c8_i32_43 = arith.constant 8 : i32
    %101 = vector.broadcast %c8_i32_43 : i32 to vector<1x128xi32>
    %102 = arith.cmpi slt, %100, %101 : vector<1x128xi32>
    %103 = arith.andi %98, %102 : vector<1x128xi1>
    %c-1_i32_44 = arith.constant -1 : i32
    %104 = vector.broadcast %c-1_i32_44 : i32 to vector<1x128xi32>
    %105 = arith.addi %18, %104 : vector<1x128xi32>
    %c0_i32_45 = arith.constant 0 : i32
    %106 = vector.broadcast %c0_i32_45 : i32 to vector<1x128xi32>
    %107 = arith.cmpi sge, %105, %106 : vector<1x128xi32>
    %108 = arith.andi %103, %107 : vector<1x128xi1>
    %c-1_i32_46 = arith.constant -1 : i32
    %109 = vector.broadcast %c-1_i32_46 : i32 to vector<1x128xi32>
    %110 = arith.addi %18, %109 : vector<1x128xi32>
    %c8_i32_47 = arith.constant 8 : i32
    %111 = vector.broadcast %c8_i32_47 : i32 to vector<1x128xi32>
    %112 = arith.cmpi slt, %110, %111 : vector<1x128xi32>
    %113 = arith.andi %108, %112 : vector<1x128xi1>
    %cst_48 = arith.constant 0.000000e+00 : f32
    %114 = vector.shape_cast %113 : vector<1x128xi1> to vector<1x128xi1>
    %115 = vector.broadcast %114 : vector<1x128xi1> to vector<8x128xi1>
    %116 = vector.broadcast %cst_48 : f32 to vector<8x128xf32>
    %117 = arith.select %115, %94, %116 : vector<8x128xi1>, vector<8x128xf32>
    %c24 = arith.constant 24 : index
    %c0_49 = arith.constant 0 : index
    %118 = vector.load %arg8[%c24, %c0_49] : memref<72x128xf32, #tpu.memory_space<vmem>>, vector<8x128xf32>
    tpu.vector_store %arg8[%c24, %c0_49], %117 {strides = array<i32>} : memref<72x128xf32, #tpu.memory_space<vmem>>, vector<8x128xf32>,
    %c32 = arith.constant 32 : index
    %c0_50 = arith.constant 0 : index
    %119 = vector.load %arg8[%c32, %c0_50] : memref<72x128xf32, #tpu.memory_space<vmem>>, vector<8x128xf32>
    tpu.vector_store %arg8[%c32, %c0_50], %16 {strides = array<i32>} : memref<72x128xf32, #tpu.memory_space<vmem>>, vector<8x128xf32>,
    %c127_i32 = arith.constant 127 : i32
    %120 = tpu.dynamic_rotate %16 by %c127_i32 dim 1 : vector<8x128xf32>, i32 -> vector<8x128xf32>
    %c0_i32_51 = arith.constant 0 : i32
    %121 = vector.broadcast %c0_i32_51 : i32 to vector<1x128xi32>
    %122 = arith.addi %17, %121 : vector<1x128xi32>
    %c0_i32_52 = arith.constant 0 : i32
    %123 = vector.broadcast %c0_i32_52 : i32 to vector<1x128xi32>
    %124 = arith.cmpi sge, %122, %123 : vector<1x128xi32>
    %c0_i32_53 = arith.constant 0 : i32
    %125 = vector.broadcast %c0_i32_53 : i32 to vector<1x128xi32>
    %126 = arith.addi %17, %125 : vector<1x128xi32>
    %c8_i32_54 = arith.constant 8 : i32
    %127 = vector.broadcast %c8_i32_54 : i32 to vector<1x128xi32>
    %128 = arith.cmpi slt, %126, %127 : vector<1x128xi32>
    %129 = arith.andi %124, %128 : vector<1x128xi1>
    %c1_i32_55 = arith.constant 1 : i32
    %130 = vector.broadcast %c1_i32_55 : i32 to vector<1x128xi32>
    %131 = arith.addi %18, %130 : vector<1x128xi32>
    %c0_i32_56 = arith.constant 0 : i32
    %132 = vector.broadcast %c0_i32_56 : i32 to vector<1x128xi32>
    %133 = arith.cmpi sge, %131, %132 : vector<1x128xi32>
    %134 = arith.andi %129, %133 : vector<1x128xi1>
    %c1_i32_57 = arith.constant 1 : i32
    %135 = vector.broadcast %c1_i32_57 : i32 to vector<1x128xi32>
    %136 = arith.addi %18, %135 : vector<1x128xi32>
    %c8_i32_58 = arith.constant 8 : i32
    %137 = vector.broadcast %c8_i32_58 : i32 to vector<1x128xi32>
    %138 = arith.cmpi slt, %136, %137 : vector<1x128xi32>
    %139 = arith.andi %134, %138 : vector<1x128xi1>
    %cst_59 = arith.constant 0.000000e+00 : f32
    %140 = vector.shape_cast %139 : vector<1x128xi1> to vector<1x128xi1>
    %141 = vector.broadcast %140 : vector<1x128xi1> to vector<8x128xi1>
    %142 = vector.broadcast %cst_59 : f32 to vector<8x128xf32>
    %143 = arith.select %141, %120, %142 : vector<8x128xi1>, vector<8x128xf32>
    %c40 = arith.constant 40 : index
    %c0_60 = arith.constant 0 : index
    %144 = vector.load %arg8[%c40, %c0_60] : memref<72x128xf32, #tpu.memory_space<vmem>>, vector<8x128xf32>
    tpu.vector_store %arg8[%c40, %c0_60], %143 {strides = array<i32>} : memref<72x128xf32, #tpu.memory_space<vmem>>, vector<8x128xf32>,
    %c121_i32 = arith.constant 121 : i32
    %145 = tpu.dynamic_rotate %16 by %c121_i32 dim 1 : vector<8x128xf32>, i32 -> vector<8x128xf32>
    %c1_i32_61 = arith.constant 1 : i32
    %146 = vector.broadcast %c1_i32_61 : i32 to vector<1x128xi32>
    %147 = arith.addi %17, %146 : vector<1x128xi32>
    %c0_i32_62 = arith.constant 0 : i32
    %148 = vector.broadcast %c0_i32_62 : i32 to vector<1x128xi32>
    %149 = arith.cmpi sge, %147, %148 : vector<1x128xi32>
    %c1_i32_63 = arith.constant 1 : i32
    %150 = vector.broadcast %c1_i32_63 : i32 to vector<1x128xi32>
    %151 = arith.addi %17, %150 : vector<1x128xi32>
    %c8_i32_64 = arith.constant 8 : i32
    %152 = vector.broadcast %c8_i32_64 : i32 to vector<1x128xi32>
    %153 = arith.cmpi slt, %151, %152 : vector<1x128xi32>
    %154 = arith.andi %149, %153 : vector<1x128xi1>
    %c-1_i32_65 = arith.constant -1 : i32
    %155 = vector.broadcast %c-1_i32_65 : i32 to vector<1x128xi32>
    %156 = arith.addi %18, %155 : vector<1x128xi32>
    %c0_i32_66 = arith.constant 0 : i32
    %157 = vector.broadcast %c0_i32_66 : i32 to vector<1x128xi32>
    %158 = arith.cmpi sge, %156, %157 : vector<1x128xi32>
    %159 = arith.andi %154, %158 : vector<1x128xi1>
    %c-1_i32_67 = arith.constant -1 : i32
    %160 = vector.broadcast %c-1_i32_67 : i32 to vector<1x128xi32>
    %161 = arith.addi %18, %160 : vector<1x128xi32>
    %c8_i32_68 = arith.constant 8 : i32
    %162 = vector.broadcast %c8_i32_68 : i32 to vector<1x128xi32>
    %163 = arith.cmpi slt, %161, %162 : vector<1x128xi32>
    %164 = arith.andi %159, %163 : vector<1x128xi1>
    %cst_69 = arith.constant 0.000000e+00 : f32
    %165 = vector.shape_cast %164 : vector<1x128xi1> to vector<1x128xi1>
    %166 = vector.broadcast %165 : vector<1x128xi1> to vector<8x128xi1>
    %167 = vector.broadcast %cst_69 : f32 to vector<8x128xf32>
    %168 = arith.select %166, %145, %167 : vector<8x128xi1>, vector<8x128xf32>
    %c48 = arith.constant 48 : index
    %c0_70 = arith.constant 0 : index
    %169 = vector.load %arg8[%c48, %c0_70] : memref<72x128xf32, #tpu.memory_space<vmem>>, vector<8x128xf32>
    tpu.vector_store %arg8[%c48, %c0_70], %168 {strides = array<i32>} : memref<72x128xf32, #tpu.memory_space<vmem>>, vector<8x128xf32>,
    %c120_i32 = arith.constant 120 : i32
    %170 = tpu.dynamic_rotate %16 by %c120_i32 dim 1 : vector<8x128xf32>, i32 -> vector<8x128xf32>
    %c1_i32_71 = arith.constant 1 : i32
    %171 = vector.broadcast %c1_i32_71 : i32 to vector<1x128xi32>
    %172 = arith.addi %17, %171 : vector<1x128xi32>
    %c0_i32_72 = arith.constant 0 : i32
    %173 = vector.broadcast %c0_i32_72 : i32 to vector<1x128xi32>
    %174 = arith.cmpi sge, %172, %173 : vector<1x128xi32>
    %c1_i32_73 = arith.constant 1 : i32
    %175 = vector.broadcast %c1_i32_73 : i32 to vector<1x128xi32>
    %176 = arith.addi %17, %175 : vector<1x128xi32>
    %c8_i32_74 = arith.constant 8 : i32
    %177 = vector.broadcast %c8_i32_74 : i32 to vector<1x128xi32>
    %178 = arith.cmpi slt, %176, %177 : vector<1x128xi32>
    %179 = arith.andi %174, %178 : vector<1x128xi1>
    %c0_i32_75 = arith.constant 0 : i32
    %180 = vector.broadcast %c0_i32_75 : i32 to vector<1x128xi32>
    %181 = arith.addi %18, %180 : vector<1x128xi32>
    %c0_i32_76 = arith.constant 0 : i32
    %182 = vector.broadcast %c0_i32_76 : i32 to vector<1x128xi32>
    %183 = arith.cmpi sge, %181, %182 : vector<1x128xi32>
    %184 = arith.andi %179, %183 : vector<1x128xi1>
    %c0_i32_77 = arith.constant 0 : i32
    %185 = vector.broadcast %c0_i32_77 : i32 to vector<1x128xi32>
    %186 = arith.addi %18, %185 : vector<1x128xi32>
    %c8_i32_78 = arith.constant 8 : i32
    %187 = vector.broadcast %c8_i32_78 : i32 to vector<1x128xi32>
    %188 = arith.cmpi slt, %186, %187 : vector<1x128xi32>
    %189 = arith.andi %184, %188 : vector<1x128xi1>
    %cst_79 = arith.constant 0.000000e+00 : f32
    %190 = vector.shape_cast %189 : vector<1x128xi1> to vector<1x128xi1>
    %191 = vector.broadcast %190 : vector<1x128xi1> to vector<8x128xi1>
    %192 = vector.broadcast %cst_79 : f32 to vector<8x128xf32>
    %193 = arith.select %191, %170, %192 : vector<8x128xi1>, vector<8x128xf32>
    %c56 = arith.constant 56 : index
    %c0_80 = arith.constant 0 : index
    %194 = vector.load %arg8[%c56, %c0_80] : memref<72x128xf32, #tpu.memory_space<vmem>>, vector<8x128xf32>
    tpu.vector_store %arg8[%c56, %c0_80], %193 {strides = array<i32>} : memref<72x128xf32, #tpu.memory_space<vmem>>, vector<8x128xf32>,
    %c119_i32 = arith.constant 119 : i32
    %195 = tpu.dynamic_rotate %16 by %c119_i32 dim 1 : vector<8x128xf32>, i32 -> vector<8x128xf32>
    %c1_i32_81 = arith.constant 1 : i32
    %196 = vector.broadcast %c1_i32_81 : i32 to vector<1x128xi32>
    %197 = arith.addi %17, %196 : vector<1x128xi32>
    %c0_i32_82 = arith.constant 0 : i32
    %198 = vector.broadcast %c0_i32_82 : i32 to vector<1x128xi32>
    %199 = arith.cmpi sge, %197, %198 : vector<1x128xi32>
    %c1_i32_83 = arith.constant 1 : i32
    %200 = vector.broadcast %c1_i32_83 : i32 to vector<1x128xi32>
    %201 = arith.addi %17, %200 : vector<1x128xi32>
    %c8_i32_84 = arith.constant 8 : i32
    %202 = vector.broadcast %c8_i32_84 : i32 to vector<1x128xi32>
    %203 = arith.cmpi slt, %201, %202 : vector<1x128xi32>
    %204 = arith.andi %199, %203 : vector<1x128xi1>
    %c1_i32_85 = arith.constant 1 : i32
    %205 = vector.broadcast %c1_i32_85 : i32 to vector<1x128xi32>
    %206 = arith.addi %18, %205 : vector<1x128xi32>
    %c0_i32_86 = arith.constant 0 : i32
    %207 = vector.broadcast %c0_i32_86 : i32 to vector<1x128xi32>
    %208 = arith.cmpi sge, %206, %207 : vector<1x128xi32>
    %209 = arith.andi %204, %208 : vector<1x128xi1>
    %c1_i32_87 = arith.constant 1 : i32
    %210 = vector.broadcast %c1_i32_87 : i32 to vector<1x128xi32>
    %211 = arith.addi %18, %210 : vector<1x128xi32>
    %c8_i32_88 = arith.constant 8 : i32
    %212 = vector.broadcast %c8_i32_88 : i32 to vector<1x128xi32>
    %213 = arith.cmpi slt, %211, %212 : vector<1x128xi32>
    %214 = arith.andi %209, %213 : vector<1x128xi1>
    %cst_89 = arith.constant 0.000000e+00 : f32
    %215 = vector.shape_cast %214 : vector<1x128xi1> to vector<1x128xi1>
    %216 = vector.broadcast %215 : vector<1x128xi1> to vector<8x128xi1>
    %217 = vector.broadcast %cst_89 : f32 to vector<8x128xf32>
    %218 = arith.select %216, %195, %217 : vector<8x128xi1>, vector<8x128xf32>
    %c64 = arith.constant 64 : index
    %c0_90 = arith.constant 0 : index
    %219 = vector.load %arg8[%c64, %c0_90] : memref<72x128xf32, #tpu.memory_space<vmem>>, vector<8x128xf32>
    tpu.vector_store %arg8[%c64, %c0_90], %218 {strides = array<i32>} : memref<72x128xf32, #tpu.memory_space<vmem>>, vector<8x128xf32>,
    %c0_91 = arith.constant 0 : index
    %c0_92 = arith.constant 0 : index
    %220 = vector.load %arg4[%c0_91, %c0_92] : memref<10x72xbf16, #tpu.memory_space<vmem>>, vector<10x72xbf16>
    %c0_93 = arith.constant 0 : index
    %c0_94 = arith.constant 0 : index
    %221 = vector.load %arg8[%c0_93, %c0_94] : memref<72x128xf32, #tpu.memory_space<vmem>>, vector<72x128xf32>
    %222 = arith.truncf %221 : vector<72x128xf32> to vector<72x128xbf16>
    %cst_95 = arith.constant dense<0.000000e+00> : vector<10x128xf32>
    %223 = tpu.matmul %220, %222, %cst_95 {dimension_numbers = #tpu.dot_dimension_numbers<[1], [0], [0], [1], [0, 0, 1, 1], [], []>} : vector<10x72xbf16>, vector<72x128xbf16>, vector<10x128xf32> -> vector<10x128xf32>
    %c0_96 = arith.constant 0 : index
    %c0_97 = arith.constant 0 : index
    %224 = vector.load %arg5[%c0_96, %c0_97] : memref<10x1xf32, #tpu.memory_space<vmem>>, vector<10x1xf32>
    %225 = vector.broadcast %224 : vector<10x1xf32> to vector<10x128xf32>
    %226 = arith.addf %223, %225 : vector<10x128xf32>
    %c0_98 = arith.constant 0 : index
    %c0_99 = arith.constant 0 : index
    %c0_100 = arith.constant 0 : index
    %227 = vector.load %arg7[%c0_98, %c0_99, %c0_100] : memref<1x10x128xf32, #tpu.memory_space<vmem>>, vector<1x10x128xf32>
    %228 = vector.shape_cast %227 : vector<1x10x128xf32> to vector<10x128xf32>
    %229 = vector.shape_cast %226 : vector<10x128xf32> to vector<1x10x128xf32>
    tpu.vector_store %arg7[%c0_98, %c0_99, %c0_100], %229 {strides = array<i32>} : memref<1x10x128xf32, #tpu.memory_space<vmem>>, vector<1x10x128xf32>,
    return
  }
  func.func @transform_0(%arg0: i32) -> (i32, i32, i32) {
    %c0_i32 = arith.constant 0 : i32
    %c0_i32_0 = arith.constant 0 : i32
    %c0_i32_1 = arith.constant 0 : i32
    return %arg0, %c0_i32, %c0_i32_0 : i32, i32, i32
  }
  func.func @transform_1(%arg0: i32) -> (i32, i32) {
    %c0_i32 = arith.constant 0 : i32
    %c0_i32_0 = arith.constant 0 : i32
    %c0_i32_1 = arith.constant 0 : i32
    return %c0_i32, %c0_i32_0 : i32, i32
  }
  func.func @transform_2(%arg0: i32) -> (i32, i32) {
    %c0_i32 = arith.constant 0 : i32
    %c0_i32_0 = arith.constant 0 : i32
    %c0_i32_1 = arith.constant 0 : i32
    return %c0_i32, %c0_i32_0 : i32, i32
  }
  func.func @transform_3(%arg0: i32) -> (i32, i32) {
    %c0_i32 = arith.constant 0 : i32
    %c0_i32_0 = arith.constant 0 : i32
    %c0_i32_1 = arith.constant 0 : i32
    return %c0_i32, %c0_i32_0 : i32, i32
  }
  func.func @transform_4(%arg0: i32) -> (i32, i32) {
    %c0_i32 = arith.constant 0 : i32
    %c0_i32_0 = arith.constant 0 : i32
    %c0_i32_1 = arith.constant 0 : i32
    return %c0_i32, %c0_i32_0 : i32, i32
  }
  func.func @transform_5(%arg0: i32) -> (i32, i32) {
    %c0_i32 = arith.constant 0 : i32
    %c0_i32_0 = arith.constant 0 : i32
    %c0_i32_1 = arith.constant 0 : i32
    return %c0_i32, %c0_i32_0 : i32, i32
  }
  func.func @transform_6(%arg0: i32) -> (i32, i32, i32) {
    %c0_i32 = arith.constant 0 : i32
    %c0_i32_0 = arith.constant 0 : i32
    %c0_i32_1 = arith.constant 0 : i32
    return %arg0, %c0_i32, %c0_i32_0 : i32, i32, i32
  }
}

</mosaic_0001>

<bundles_post_ra>
// kernel: conv_down.1
= control target key start
LH: loop header
LB: loop body
LE: loop exit
PB: predicated region body
PF: predicated region fallthrough
CT: control target
= control target key end

     0   :  { %s724_s21 = smov 0   ;;  %s869_s0 = inlined_call_operand.vmem [shape: bf16[2,32,128], index: 0, kind: input, shape index: {}]   ;;  %s870_s1 = inlined_call_operand.vmem [shape: bf16[8,32], index: 1, kind: input, shape index: {}]   ;;  %s871_s2 = inlined_call_operand.vmem [shape: f32[8,1], index: 2, kind: input, shape index: {}]   ;;  %s872_s3 = inlined_call_operand.vmem [shape: bf16[10,72], index: 3, kind: input, shape index: {}]   ;;  %s873_s4 = inlined_call_operand.vmem [shape: f32[10,1], index: 4, kind: input, shape index: {}]   ;;  %s874_s5 = inlined_call_operand.vmem [shape: s32[2,128], index: 5, kind: input, shape index: {}]   ;;  %s875_s6 = inlined_call_operand.vmem [shape: f32[2,10,128], index: 6, kind: output, shape index: {}]  }
   0x1 LB: > { %s585_s22 = sadd.s32 4294967295, %s676_s21   ;;  %p589_p0 = scmp.ge.s32.totalorder %s676_s21, 1  ;;  %s676_s21 = sphi %s724_s21, %s16_s21  }
   0x2   : > { %p212_p1 = scmp.lt.s32.totalorder %s676_s21, 3 }
   0x4   : > { %p213_p2 = pnand %p589_p0, %p212_p1 }
   0x5   : > { %p242_p3 = scmp.lt.s32.totalorder (!%p213_p2), %s585_s22, 1  ;;  %v678_v0 = vmov (!%p213_p2), 0.0   ;;  %vm679_vm0 = vmmov (!%p213_p2), 0   ;;  %v258_v1 = vld [vmem:[%s871_s2] sm:$0xff] (!%p213_p2)  ;;  %v680_v2 = vmov (!%p213_p2), 0   ;;  %vm276_vm1 = vcmask (!%p213_p2), 261120  }
   0x6   : > { %216 = sbr.rel (%p213_p2) target bundleno = 596 (0x254), region = 44  ;;  %624 = vmatprep.subr.bf16.mxu0 (!%p213_p2), %v678_v0  ;;  %628 = vmatprep.mubr.msk.bf16.mxu0 (!%p213_p2), %vm679_vm0, %v678_v0  ;;  %v253_v5 = vld [vmem:[%s870_s1] sm:$0xf] (!%p213_p2)  ;;  %v322_v7 = vlaneseq (!%p213_p2)  ;;  %s681_s11 = smov (!%p213_p2), 8   ;;  %v463_v26 = vld [vmem:[%s873_s4 + $0x8] sm:$0x3] (!%p213_p2) }
   0x7   : > { %665 = vset.pattern.permute.xlu0 (!%p213_p2), %v680_v2  ;;  %632 = vmatprep.subr.bf16.mxu1 (!%p213_p2), %v678_v0  ;;  %v756_v6 = vld [vmem:[%s874_s5 + $0x1] sm:$0x1] (!%p213_p2)  ;;  %v328_v8 = vld [vmem:[%s874_s5] sm:$0x1] (!%p213_p2)  ;;  %s682_s12 = smov (!%p213_p2), 9   ;;  %s683_s13 = smov (!%p213_p2), 7  }
   0x8   : > { %261 = vperm.xlu0 (!%p213_p2), %665, %v258_v1   ;;  %642 = vmatprep.mubr.msk.bf16.mxu1 (!%p213_p2), %vm679_vm0, %v678_v0  ;;  %v762_v9 = vadd.s32 (!%p213_p2), 1, %v756_v6  ;;  %vm380_vm2 = vcmp.ge.s32.totalorder (!%p213_p2), %v328_v8, 0  ;;  %vm381_vm3 = vcmp.lt.s32.totalorder (!%p213_p2), %v328_v8, 8  ;;  %v343_v10 = vshrl.u32 (!%p213_p2), %v322_v7, 7  ;;  %s684_s14 = smov (!%p213_p2), 1   ;;  %s685_s15 = smov (!%p213_p2), 127  }
   0x9   : > { %666 = vset.pattern.permute.xlu1 (!%p213_p2), %v680_v2  ;;  %vm765_vm5 = vmand (!%p213_p2), %vm380_vm2, %vm381_vm3  ;;  %v323_v14 = vand.u32 (!%p213_p2), 127, %v322_v7  ;;  %s686_s16 = smov (!%p213_p2), 121   ;;  %s687_s17 = smov (!%p213_p2), 120   ;;  %v462_v27 = vld [vmem:[%s873_s4] sm:$0xff] (!%p213_p2)  ;;  %v332_v28 = vadd.s32 (!%p213_p2), 4294967295, %v328_v8  ;;  %v336_v29 = vadd.s32 (!%p213_p2), 4294967295, %v756_v6 }
   0xa   : > { %vm366_vm4 = vcmp.ge.s32.totalorder (!%p213_p2), %v762_v9, 0  ;;  %vm877_vm6 = vcmp.lt.s32.totalorder (!%p213_p2), %v762_v9, 8  ;;  %v774_v16 = vsub.s32 (!%p213_p2), 0, %v343_v10  ;;  %s688_s18 = smov (!%p213_p2), 119   ;;  %vm351_vm0 = vcmp.ge.s32.totalorder (!%p213_p2), %v756_v6, 0 }
   0xb   : > { %vm396_vm7 = vmand (!%p213_p2), %vm765_vm5, %vm366_vm4  ;;  %vm324_vm9 = vcmp.lt.s32.totalorder (!%p213_p2), %v323_v14, 64  ;;  %vm333_vm12 = vcmp.ge.s32.totalorder (!%p213_p2), %v332_v28, 0  ;;  %vm334_vm13 = vcmp.lt.s32.totalorder (!%p213_p2), %v332_v28, 8  ;;  %vm337_vm15 = vcmp.ge.s32.totalorder (!%p213_p2), %v336_v29, 0  ;;  %v669_v62 = vld [vmem:[%s872_s3] sm:$0x1f] (!%p213_p2)  }
   0xc   : > { %vm397_vm8 = vmand (!%p213_p2), %vm396_vm7, %vm877_vm6  ;;  %vm339_vm2 = vcmp.lt.s32.totalorder (!%p213_p2), %v336_v29, 8  ;;  %vm876_vm7 = vcmp.lt.s32.totalorder (!%p213_p2), %v756_v6, 8  ;;  %v408_v32 = vadd.s32 (!%p213_p2), 1, %v328_v8 }
   0xd   : > { %s890_s22 = smov (!%p242_p3, %s585_s22), 1  ;;  %v398_v19 = vsel %vm397_vm8, 1, %v680_v2  ;;  %vm335_vm14 = vmand %vm333_vm12, %vm334_vm13 }
   0xe   : > { %s601_s25 = sshll.u32 %s890_s22, 4  ;;  %v402_v22 = vrot.slane %v398_v19, %v774_v16  ;;  %vm352_vm3 = vmand %vm335_vm14, %vm351_vm0  ;;  %vm409_vm13 = vcmp.ge.s32.totalorder %v408_v32, 0 }
   0xf   : > { %s246_s28 = scalar_lea.vmem %s869_s0, %s601_s25  ;;  %vm383_vm12 = vmand %vm765_vm5, %vm337_vm15  ;;  %s251_s30 = scalar_lea.vmem %s875_s6, %s601_s25 }
  0x10   : > { %v667_v3 = vld [vmem:[%s246_s28] sm:$0xff]   ;;  %v668_v4 = vld [vmem:[%s246_s28 + $0x8] sm:$0xff]   ;;  %vm403_vm10 = vcmp.eq.s32.totalorder %v402_v22, 1 }
  0x11   : > { %625 = vmatpush3.bf16.msra.mxu0 %v667_v3  ;;  %vm782_vm11 = vmpackc.low %vm403_vm10, %vm324_vm9 }
  0x12   : > { %626 = vmatprep.subr.bf16.mxu0 %v678_v0  ;;  %vm367_vm10 = vmand %vm335_vm14, %vm366_vm4 }
  0x15   : > { %627 = vmatpush3.bf16.msra.mxu0 %v668_v4 }
  0x18   : > { %629 = vmatmul.mubr.msk.bf16.vlgmr.msra.gmra.mrb[0].mxu0 %vm276_vm1, %v253_v5  ;;  %vm338_vm1 = vmand %vm335_vm14, %vm337_vm15 }
  0x19   : > { %vm340_vm8 = vmand %vm338_vm1, %vm339_vm2  ;;  %vm410_vm1 = vcmp.lt.s32.totalorder %v408_v32, 8 }
  0x1a   : > { %v341_v30 = vsel %vm340_vm8, 1, %v680_v2  ;;  %vm411_vm14 = vmand %vm409_vm13, %vm410_vm1  ;;  %vm886_vm1 = vcmp.lt.s32.totalorder %v756_v6, 8 }
  0x1b   : > { %v345_v33 = vrot.slane %v341_v30, %v774_v16 }
  0x1d   : > { %vm813_vm8 = vcmp.eq.s32.totalorder %v345_v33, 1 }
  0x87   : > { %v262_v11 = vpop.permute.xlu0 %261 }
  0xeb   : > { %v314_v13 = vpop.f32.mrb[0].mxu0 }
  0xec   : > { %v315_v15 = vadd.f32 %v314_v13, %v262_v11  ;;  %v630_v17 = vpop.f32.mrb[1].mxu0 }
  0xed   : > { %v317_v18 = vpop.f32.mrb[2].mxu0 }
  0xee   : > { %v320_v20 = vmul.f32 0.01, %v315_v15  ;;  %v631_v21 = vpop.f32.mrb[3].mxu0 }
  0xf0   : > { %v780_v23 = vmax.f32 %v315_v15, %v320_v20 }
  0xf2   : > { %v327_v25 = vsel %vm324_vm9, %v780_v23, 0.0  ;;  %vm354_vm9 = vmand %vm352_vm3, %vm876_vm7 }
  0xf3   : > { %349 = vrot.lane.b32.xlu1 %v327_v25, %s681_s11  ;;  %330 = vrot.lane.b32.xlu0 %v327_v25, %s682_s12  ;;  %v355_v31 = vsel %vm354_vm9, 1, %v680_v2  ;;  %vm369_vm3 = vmand %vm367_vm10, %vm877_vm6 }
  0xf4   : > { %v359_v34 = vrot.slane %v355_v31, %v774_v16  ;;  %vm384_vm7 = vmand %vm383_vm12, %vm339_vm2  ;;  %v370_v37 = vsel %vm369_vm3, 1, %v680_v2 }
  0xf5   : > { %v385_v38 = vsel %vm384_vm7, 1, %v680_v2  ;;  %vm412_vm10 = vmand %vm411_vm14, %vm337_vm15  ;;  %v374_v39 = vrot.slane %v370_v37, %v774_v16  ;;  %vm887_vm7 = vcmp.lt.s32.totalorder %v762_v9, 8 }
  0xf6   : > { %vm817_vm9 = vcmp.eq.s32.totalorder %v359_v34, 1  ;;  %vm424_vm6 = vmand %vm411_vm14, %vm351_vm0  ;;  %v389_v40 = vrot.slane %v385_v38, %v774_v16 }
  0xf7   : > { %363 = vrot.lane.b32.xlu1 %v327_v25, %s683_s13  ;;  %378 = vrot.lane.b32.xlu0 %v327_v25, %s684_s14  ;;  %vm436_vm12 = vmand %vm411_vm14, %vm366_vm4  ;;  %vm375_vm3 = vcmp.eq.s32.totalorder %v374_v39, 1 }
  0xf8   : > { %vm413_vm13 = vmand %vm412_vm10, %vm339_vm2  ;;  %vm390_vm0 = vcmp.eq.s32.totalorder %v389_v40, 1 }
  0xf9   : > { %vm425_vm5 = vmand %vm424_vm6, %vm886_vm1  ;;  %v414_v44 = vsel %vm413_vm13, 1, %v680_v2 }
  0xfa   : > { %vm437_vm15 = vmand %vm436_vm12, %vm887_vm7  ;;  %v426_v45 = vsel %vm425_vm5, 1, %v680_v2  ;;  %v418_v50 = vrot.slane %v414_v44, %v774_v16  ;;  %vm483_vm5 = vcmask 1043456  }
  0xfb   : > { %394 = vrot.lane.b32.xlu1 %v327_v25, %s685_s15  ;;  %406 = vrot.lane.b32.xlu0 %v327_v25, %s686_s16  ;;  %vm888_vm4 = vmpackc.low %vm817_vm9, %vm813_vm8  ;;  %v438_v46 = vsel %vm437_vm15, 1, %v680_v2  ;;  %v430_v51 = vrot.slane %v426_v45, %v774_v16 }
  0xfc   : > { %vm606_vm6 = vmpackc.low %vm390_vm0, %vm375_vm3  ;;  %v442_v52 = vrot.slane %v438_v46, %v774_v16  ;;  %vm419_vm2 = vcmp.eq.s32.totalorder %v418_v50, 1 }
  0xfd   : > { %vm431_vm8 = vcmp.eq.s32.totalorder %v430_v51, 1 }
  0xfe   : > { %vm443_vm9 = vcmp.eq.s32.totalorder %v442_v52, 1  ;;  %vm612_vm14 = vmpackc.low %vm431_vm8, %vm419_vm2 }
  0xff   : > { %422 = vrot.lane.b32.xlu1 %v327_v25, %s687_s17  ;;  %434 = vrot.lane.b32.xlu0 %v327_v25, %s688_s18 }
 0x103   : > { %471 = vperm.xlu0 %665, %v463_v26   ;;  %466 = vperm.xlu1 %666, %v462_v27  }
 0x165   : > { %v350_v41 = vpop.permute.xlu1 %349  ;;  %v331_v42 = vpop.permute.xlu0 %330 }
 0x166   : > { %v604_v43 = vpack.c.bf16 %v350_v41, %v331_v42 }
 0x168   : > { %633 = vmatpush3.bf16.msk.msra.mxu1 %vm888_vm4, %v604_v43 }
 0x169   : > { %v364_v47 = vpop.permute.xlu1 %363  ;;  %v379_v48 = vpop.permute.xlu0 %378  ;;  %634 = vmatprep.subr.bf16.mxu1 %v678_v0 }
 0x16a   : > { %v607_v49 = vpack.c.bf16 %v379_v48, %v364_v47 }
 0x16c   : > { %635 = vmatpush3.bf16.msk.msra.mxu1 %vm606_vm6, %v607_v49 }
 0x16d   : > { %v395_v53 = vpop.permute.xlu1 %394  ;;  %v407_v54 = vpop.permute.xlu0 %406  ;;  %636 = vmatprep.subr.bf16.mxu1 %v678_v0 }
 0x16e   : > { %v610_v55 = vpack.c.bf16 %v395_v53, %v780_v23 }
 0x170   : > { %637 = vmatpush3.bf16.msk.msra.mxu1 %vm782_vm11, %v610_v55  ;;  %vm479_vm11 = vcmask 588800  }
 0x171   : > { %v423_v56 = vpop.permute.xlu1 %422  ;;  %v435_v57 = vpop.permute.xlu0 %434  ;;  %638 = vmatprep.subr.bf16.mxu1 %v678_v0 }
 0x172   : > { %v613_v58 = vpack.c.bf16 %v423_v56, %v407_v54  ;;  %v444_v59 = vsel %vm443_vm9, %v435_v57, 0.0 }
 0x173   : > { %v461_v60 = vpack.c.bf16 %v444_v59, %v444_v59 }
 0x174   : > { %639 = vmatpush3.bf16.msk.msra.mxu1 %vm612_vm14, %v613_v58 }
 0x175   : > { %640 = vmatprep.subr.bf16.mxu1 %v678_v0  ;;  %v485_v61 = vsel %vm483_vm5, %v461_v60, 0 }
 0x178   : > { %641 = vmatpush3.bf16.msra.mxu1 %v485_v61 }
 0x17b   : > { %643 = vmatmul.mubr.msk.bf16.vlgmr.msra.gmra.mrb[0].mxu1 %vm479_vm11, %v669_v62 }
 0x182   : > { %v467_v63 = vpop.permute.xlu1 %466  ;;  %v472_v4 = vpop.permute.xlu0 %471 }
 0x24e   : > { %v521_v1 = vpop.f32.mrb[0].mxu1 }
 0x24f   : > { %v522_v2 = vadd.f32 %v521_v1, %v467_v63  ;;  %v644_v3 = vpop.f32.mrb[1].mxu1 }
 0x250   : > { %v524_v5 = vpop.f32.mrb[2].mxu1 }
 0x251   : > { %528 = vst [vmem:[%s251_s30] sm:$0xff] %v522_v2  ;;  %v525_v0 = vadd.f32 %v524_v5, %v472_v4  ;;  %v645_v6 = vpop.f32.mrb[3].mxu1 }
 0x253   : > { %529 = vst [vmem:[%s251_s30 + $0x8] sm:$0x3] %v525_v0 }
 0x254 PF: > { %s16_s21 = sadd.s32 1, %s676_s21  }
 0x255   : > { %p13_p4 = scmp.ge.s32.totalorder %s16_s21, 4  }
 0x257   :  { %15 = sbr.rel (!%p13_p4) target bundleno = 1 (0x1), region = 74 }

</bundles_post_ra>
